<compile_context>
chip_gen: v6e
topology: v6e:2x2x1
jax: 0.10.0
libtpu: 0.0.40
codegen_flags: <defaults>
</compile_context>

<pallas_src>
import jax
import jax.numpy as jnp
from jax.experimental import pallas as pl
from jax.experimental.pallas import tpu as pltpu


# ---------------------------------------------------------------------------
# Kernel construction
# ---------------------------------------------------------------------------

def _layer_strategies(layer_sizes):
    """Per-layer compute strategy for the transposed-layout kernel."""
    strats = []
    for n_in, n_out in zip(layer_sizes[:-1], layer_sizes[1:]):
        if n_in <= 8:
            strats.append("fma")      # weight passed as (n_out, n_in); VPU FMAs over K
        elif n_out == 1:
            strats.append("reduce")   # weight passed as (n_in, 1); VPU mul + sublane reduce
        else:
            strats.append("mxu")      # weight passed as (n_out, n_in); MXU matmul
    return strats


def _build_kernel(layer_sizes, bf16_tanh):
    strategies = _layer_strategies(layer_sizes)
    num_layers = len(strategies)

    def kernel(xt_ref, *refs):
        # refs = (w0, b0, w1, b1, ..., o_ref); weights already laid out per strategy.
        o_ref = refs[-1]
        prm = refs[:-1]
        h = xt_ref[...]                          # (d_in, tm): batch on lanes
        for l in range(num_layers):
            w = prm[2 * l][...]
            b = prm[2 * l + 1][...]              # (n_out, 1): broadcasts over lanes
            strat = strategies[l]
            if strat == "fma":
                # Tiny-K layer: plain VPU fused multiply-adds, no MXU round trip.
                n_in = w.shape[1]
                z = w[:, 0:1] * h[0:1, :]
                for k in range(1, n_in):
                    z = z + w[:, k:k + 1] * h[k:k + 1, :]
                z = z + b
            elif strat == "reduce":
                # n_out == 1: VPU multiply + cross-sublane (XLU) reduce.
                z = jnp.sum(w * h, axis=0, keepdims=True) + b
            else:
                z = jnp.dot(w, h, preferred_element_type=jnp.float32) + b
            if l < num_layers - 1:
                if bf16_tanh:
                    # Halves EUP pushes on bf16-capable v6e/v7x; accumulation stays f32.
                    z = jnp.tanh(z.astype(jnp.bfloat16)).astype(jnp.float32)
                else:
                    z = jnp.tanh(z)
            h = z
        o_ref[...] = h                           # (d_out, tm): lane-dense store

    return kernel, strategies


def _choose_tile(n):
    """Row tile: multiple of 128, >=2 grid steps when n>128 (v7x megacore),
    capped at 8192 to amortize per-step overhead on v5e/v6e."""
    chunks = pl.cdiv(n, 128)               # number of 128-point lane chunks
    if chunks <= 1:
        return 128
    steps = max(2, pl.cdiv(chunks, 64))    # tile <= 64*128 = 8192 points
    return int(pl.cdiv(chunks, steps)) * 128


# ---------------------------------------------------------------------------
# Wrappers
# ---------------------------------------------------------------------------

def dnn_forward_t(x_t, lb, ub, params, *, tm=None, bf16_tanh=False):
    """Fast path (review option (a)): feature-major input/output.

    x_t: (d_in, N) f32 collocation points (feature-major; zero-copy).
    Returns (d_out, N) f32.  No XLA transpose pass on either side.
    """
    x_t = jnp.asarray(x_t, jnp.float32)
    d_in, n = x_t.shape
    layer_sizes = [d_in] + [int(w.shape[1]) for (w, _) in params]
    d_out = layer_sizes[-1]

    # Fold (x - lb)/(ub - lb) into layer 0:  x_norm = x*scale + shift.
    scale = 1.0 / (jnp.asarray(ub, jnp.float32) - jnp.asarray(lb, jnp.float32))
    shift = -jnp.asarray(lb, jnp.float32) * scale
    w0 = jnp.asarray(params[0][0], jnp.float32)
    b0 = jnp.asarray(params[0][1], jnp.float32)
    folded = [(w0 * scale[:, None], b0 + shift @ w0)]
    folded += [(jnp.asarray(w, jnp.float32), jnp.asarray(b, jnp.float32))
               for (w, b) in params[1:]]

    kernel, strategies = _build_kernel(layer_sizes, bf16_tanh)

    # Lay out weights for the transposed (feature-on-sublane, batch-on-lane) kernel.
    args = []
    for (w, b), strat in zip(folded, strategies):
        wk = w if strat == "reduce" else w.T          # (n_in, 1) or (n_out, n_in)
        args.append(wk)
        args.append(b.reshape(-1, 1))

    # Row tile + zero-padding so every tile is a full 128-lane multiple.
    if tm is None:
        tm = _choose_tile(n)
    else:
        tm = max(128, int(pl.cdiv(int(tm), 128)) * 128)
    grid_m = int(pl.cdiv(n, tm))
    n_pad = grid_m * tm
    if n_pad != n:
        x_t = jnp.pad(x_t, ((0, 0), (0, n_pad - n)))

    cols = lambda i: (0, i)                            # tile over batch columns
    full = lambda i: (0, 0)                            # parameters: resident full block

    in_specs = [pl.BlockSpec((d_in, tm), cols)]
    in_specs += [pl.BlockSpec(a.shape, full) for a in args]
    out_specs = pl.BlockSpec((d_out, tm), cols)

    flops = 2 * n_pad * sum(a * b for a, b in zip(layer_sizes[:-1], layer_sizes[1:]))
    transcendentals = n_pad * sum(layer_sizes[1:-1])
    bytes_accessed = 4 * (n_pad * (d_in + d_out) + sum(int(a.size) for a in args))

    out_t = pl.pallas_call(
        kernel,
        out_shape=jax.ShapeDtypeStruct((d_out, n_pad), jnp.float32),
        grid_spec=pltpu.PrefetchScalarGridSpec(
            num_scalar_prefetch=0,
            grid=(grid_m,),
            in_specs=in_specs,
            out_specs=out_specs,
        ),
        compiler_params=pltpu.CompilerParams(
            dimension_semantics=("parallel",),
            # Let XLA fuse the producer of x_t (e.g. a transpose/pad from the
            # module-compatible wrapper) into this call instead of emitting a
            # standalone HBM pass (review option (c)).
            allow_input_fusion=[True] + [False] * len(args),
        ),
        cost_estimate=pl.CostEstimate(
            flops=flops,
            transcendentals=transcendentals,
            bytes_accessed=bytes_accessed),
    )(x_t, *args)

    if n_pad != n:
        out_t = out_t[:, :n]
    return out_t                                        # (d_out, N)


def dnn_forward(x, lb, ub, params, *, tm=None, bf16_tanh=False):
    """Module-compatible entry: x (N, d_in) -> (N, d_out)."""
    x = jnp.asarray(x, jnp.float32)
    n = x.shape[0]
    out_t = dnn_forward_t(x.T, lb, ub, params, tm=tm, bf16_tanh=bf16_tanh)
    d_out = out_t.shape[0]
    if d_out == 1:
        # (1, N) and (N, 1) share the same flat layout: free reshape, no transpose.
        return out_t.reshape(n, 1)
    return out_t.T


# ---------------------------------------------------------------------------
# Parameter init (matches weights_init: xavier-uniform W, zero b) + reference
# ---------------------------------------------------------------------------

def xavier_uniform(key, n_in, n_out):
    bound = jnp.sqrt(6.0 / (n_in + n_out))
    return jax.random.uniform(key, (n_in, n_out), jnp.float32, -bound, bound)


def init_params(key, layers):
    params = []
    for n_in, n_out in zip(layers[:-1], layers[1:]):
        key, sub = jax.random.split(key)
        params.append((xavier_uniform(sub, n_in, n_out), jnp.zeros((n_out,), jnp.float32)))
    return params


def reference_forward(x, lb, ub, params):
    """Pure-JAX reference of the PyTorch forward."""
    h = (x - lb) / (ub - lb)
    n = len(params)
    for i, (w, b) in enumerate(params):
        h = h @ w + b
        if i < n - 1:
            h = jnp.tanh(h)
    return h


if __name__ == "__main__":
    # Small PINN-like configuration: layers = [2, 32, 32, 1]
    layers = [2, 32, 32, 1]
    lb = jnp.array([-1.0, 0.0], dtype=jnp.float32)
    ub = jnp.array([1.0, 2.0], dtype=jnp.float32)

    key = jax.random.PRNGKey(0)
    key_p, key_x, key_x2 = jax.random.split(key, 3)
    params = init_params(key_p, layers)

    # --- default path: N=256 -> tm=128, grid=(2,) (>=2 parallel steps for v7x)
    N = 256
    x = jax.random.uniform(key_x, (N, layers[0]), jnp.float32, minval=lb, maxval=ub)
    ref = reference_forward(x, lb, ub, params)

    out = jax.block_until_ready(dnn_forward(x, lb, ub, params))
    assert out.shape == (N, layers[-1])
    assert jnp.allclose(out, ref, atol=1e-5, rtol=1e-5), \
        f"max err {jnp.max(jnp.abs(out - ref))}"

    # --- feature-major fast path (no transposes at all)
    out_fm = jax.block_until_ready(dnn_forward_t(x.T, lb, ub, params))
    assert out_fm.shape == (layers[-1], N)
    assert jnp.allclose(out_fm.reshape(N, 1), ref, atol=1e-5, rtol=1e-5), \
        f"max err (feature-major) {jnp.max(jnp.abs(out_fm.reshape(N, 1) - ref))}"

    # --- awkward batch size: exercises zero-padding + lane-dense tiles
    N2 = 300
    x2 = jax.random.uniform(key_x2, (N2, layers[0]), jnp.float32, minval=lb, maxval=ub)
    ref2 = reference_forward(x2, lb, ub, params)
    out2 = jax.block_until_ready(dnn_forward(x2, lb, ub, params))
    assert out2.shape == (N2, layers[-1])
    assert jnp.allclose(out2, ref2, atol=1e-5, rtol=1e-5), \
        f"max err (padded) {jnp.max(jnp.abs(out2 - ref2))}"

    # --- optional bf16-tanh lever (v6e/v7x): validate at loose tolerance
    out_bf16 = jax.block_until_ready(dnn_forward(x, lb, ub, params, bf16_tanh=True))
    assert jnp.all(jnp.isfinite(out_bf16))
    assert jnp.max(jnp.abs(out_bf16 - ref)) < 0.1, \
        f"max err (bf16 tanh) {jnp.max(jnp.abs(out_bf16 - ref))}"

    print("KERNEL_OK")
</pallas_src>

<mosaic_0001>
module attributes {stable_mosaic.version = 11 : i64} {
  func.func @kernel(%arg0: i32, %arg1: memref<2x128xf32, #tpu.memory_space<vmem>>, %arg2: memref<32x2xf32, #tpu.memory_space<vmem>>, %arg3: memref<32x1xf32, #tpu.memory_space<vmem>>, %arg4: memref<32x32xf32, #tpu.memory_space<vmem>>, %arg5: memref<32x1xf32, #tpu.memory_space<vmem>>, %arg6: memref<32x1xf32, #tpu.memory_space<vmem>>, %arg7: memref<1x1xf32, #tpu.memory_space<vmem>>, %arg8: memref<1x128xf32, #tpu.memory_space<vmem>>) attributes {dimension_semantics = [#tpu.dimension_semantics<parallel>], iteration_bounds = array<i64: 2>, scalar_prefetch = 0 : i64, scratch_operands = 0 : i64, tpu.core_type = #tpu.core_type<tc>, window_params = [{transform_indices = @transform_0, window_bounds = array<i64: 2, 128>}, {pipeline_mode = #tpu.pipeline_mode<synchronous>, transform_indices = @transform_1, window_bounds = array<i64: 32, 2>}, {pipeline_mode = #tpu.pipeline_mode<synchronous>, transform_indices = @transform_2, window_bounds = array<i64: 32, 1>}, {pipeline_mode = #tpu.pipeline_mode<synchronous>, transform_indices = @transform_3, window_bounds = array<i64: 32, 32>}, {pipeline_mode = #tpu.pipeline_mode<synchronous>, transform_indices = @transform_4, window_bounds = array<i64: 32, 1>}, {pipeline_mode = #tpu.pipeline_mode<synchronous>, transform_indices = @transform_5, window_bounds = array<i64: 32, 1>}, {pipeline_mode = #tpu.pipeline_mode<synchronous>, transform_indices = @transform_6, window_bounds = array<i64: 1, 1>}, {transform_indices = @transform_7, window_bounds = array<i64: 1, 128>}]} {
    %c0 = arith.constant 0 : index
    %c0_0 = arith.constant 0 : index
    %0 = vector.load %arg1[%c0, %c0_0] : memref<2x128xf32, #tpu.memory_space<vmem>>, vector<2x128xf32>
    %c0_1 = arith.constant 0 : index
    %c0_2 = arith.constant 0 : index
    %1 = vector.load %arg2[%c0_1, %c0_2] : memref<32x2xf32, #tpu.memory_space<vmem>>, vector<32x2xf32>
    %c0_3 = arith.constant 0 : index
    %c0_4 = arith.constant 0 : index
    %2 = vector.load %arg3[%c0_3, %c0_4] : memref<32x1xf32, #tpu.memory_space<vmem>>, vector<32x1xf32>
    %3 = vector.extract_strided_slice %1 {offsets = [0, 0], sizes = [32, 1], strides = [1, 1]} : vector<32x2xf32> to vector<32x1xf32>
    %4 = vector.extract_strided_slice %0 {offsets = [0, 0], sizes = [1, 128], strides = [1, 1]} : vector<2x128xf32> to vector<1x128xf32>
    %5 = vector.broadcast %3 : vector<32x1xf32> to vector<32x128xf32>
    %6 = vector.broadcast %4 : vector<1x128xf32> to vector<32x128xf32>
    %7 = arith.mulf %5, %6 : vector<32x128xf32>
    %8 = vector.extract_strided_slice %1 {offsets = [0, 1], sizes = [32, 1], strides = [1, 1]} : vector<32x2xf32> to vector<32x1xf32>
    %9 = vector.extract_strided_slice %0 {offsets = [1, 0], sizes = [1, 128], strides = [1, 1]} : vector<2x128xf32> to vector<1x128xf32>
    %10 = vector.broadcast %8 : vector<32x1xf32> to vector<32x128xf32>
    %11 = vector.broadcast %9 : vector<1x128xf32> to vector<32x128xf32>
    %12 = arith.mulf %10, %11 : vector<32x128xf32>
    %13 = arith.addf %7, %12 : vector<32x128xf32>
    %14 = vector.broadcast %2 : vector<32x1xf32> to vector<32x128xf32>
    %15 = arith.addf %13, %14 : vector<32x128xf32>
    %16 = math.tanh %15 : vector<32x128xf32>
    %c0_5 = arith.constant 0 : index
    %c0_6 = arith.constant 0 : index
    %17 = vector.load %arg4[%c0_5, %c0_6] : memref<32x32xf32, #tpu.memory_space<vmem>>, vector<32x32xf32>
    %c0_7 = arith.constant 0 : index
    %c0_8 = arith.constant 0 : index
    %18 = vector.load %arg5[%c0_7, %c0_8] : memref<32x1xf32, #tpu.memory_space<vmem>>, vector<32x1xf32>
    %cst = arith.constant dense<0.000000e+00> : vector<32x128xf32>
    %19 = tpu.matmul %17, %16, %cst {dimension_numbers = #tpu.dot_dimension_numbers<[1], [0], [0], [1], [0, 0, 1, 1], [], []>} : vector<32x32xf32>, vector<32x128xf32>, vector<32x128xf32> -> vector<32x128xf32>
    %20 = vector.broadcast %18 : vector<32x1xf32> to vector<32x128xf32>
    %21 = arith.addf %19, %20 : vector<32x128xf32>
    %22 = math.tanh %21 : vector<32x128xf32>
    %c0_9 = arith.constant 0 : index
    %c0_10 = arith.constant 0 : index
    %23 = vector.load %arg6[%c0_9, %c0_10] : memref<32x1xf32, #tpu.memory_space<vmem>>, vector<32x1xf32>
    %c0_11 = arith.constant 0 : index
    %c0_12 = arith.constant 0 : index
    %24 = vector.load %arg7[%c0_11, %c0_12] : memref<1x1xf32, #tpu.memory_space<vmem>>, vector<1x1xf32>
    %25 = vector.broadcast %23 : vector<32x1xf32> to vector<32x128xf32>
    %26 = arith.mulf %25, %22 : vector<32x128xf32>
    %cst_13 = arith.constant dense<0.000000e+00> : vector<128xf32>
    %27 = vector.multi_reduction <add>, %26, %cst_13 [0] : vector<32x128xf32> to vector<128xf32>
    %28 = vector.shape_cast %27 : vector<128xf32> to vector<1x128xf32>
    %29 = vector.broadcast %24 : vector<1x1xf32> to vector<1x128xf32>
    %30 = arith.addf %28, %29 : vector<1x128xf32>
    %c0_14 = arith.constant 0 : index
    %c0_15 = arith.constant 0 : index
    %31 = vector.load %arg8[%c0_14, %c0_15] : memref<1x128xf32, #tpu.memory_space<vmem>>, vector<1x128xf32>
    tpu.vector_store %arg8[%c0_14, %c0_15], %30 {strides = array<i32>} : memref<1x128xf32, #tpu.memory_space<vmem>>, vector<1x128xf32>,
    return
  }
  func.func @transform_0(%arg0: i32) -> (i32, i32) {
    %c0_i32 = arith.constant 0 : i32
    %c0_i32_0 = arith.constant 0 : i32
    return %c0_i32, %arg0 : i32, i32
  }
  func.func @transform_1(%arg0: i32) -> (i32, i32) {
    %c0_i32 = arith.constant 0 : i32
    %c0_i32_0 = arith.constant 0 : i32
    %c0_i32_1 = arith.constant 0 : i32
    return %c0_i32, %c0_i32_0 : i32, i32
  }
  func.func @transform_2(%arg0: i32) -> (i32, i32) {
    %c0_i32 = arith.constant 0 : i32
    %c0_i32_0 = arith.constant 0 : i32
    %c0_i32_1 = arith.constant 0 : i32
    return %c0_i32, %c0_i32_0 : i32, i32
  }
  func.func @transform_3(%arg0: i32) -> (i32, i32) {
    %c0_i32 = arith.constant 0 : i32
    %c0_i32_0 = arith.constant 0 : i32
    %c0_i32_1 = arith.constant 0 : i32
    return %c0_i32, %c0_i32_0 : i32, i32
  }
  func.func @transform_4(%arg0: i32) -> (i32, i32) {
    %c0_i32 = arith.constant 0 : i32
    %c0_i32_0 = arith.constant 0 : i32
    %c0_i32_1 = arith.constant 0 : i32
    return %c0_i32, %c0_i32_0 : i32, i32
  }
  func.func @transform_5(%arg0: i32) -> (i32, i32) {
    %c0_i32 = arith.constant 0 : i32
    %c0_i32_0 = arith.constant 0 : i32
    %c0_i32_1 = arith.constant 0 : i32
    return %c0_i32, %c0_i32_0 : i32, i32
  }
  func.func @transform_6(%arg0: i32) -> (i32, i32) {
    %c0_i32 = arith.constant 0 : i32
    %c0_i32_0 = arith.constant 0 : i32
    %c0_i32_1 = arith.constant 0 : i32
    return %c0_i32, %c0_i32_0 : i32, i32
  }
  func.func @transform_7(%arg0: i32) -> (i32, i32) {
    %c0_i32 = arith.constant 0 : i32
    %c0_i32_0 = arith.constant 0 : i32
    return %c0_i32, %arg0 : i32, i32
  }
}

</mosaic_0001>

<bundles_post_ra>
// kernel: tpu_custom_call.1
= control target key start
LH: loop header
LB: loop body
LE: loop exit
PB: predicated region body
PF: predicated region fallthrough
CT: control target
= control target key end

     0   :  { %s988_s0 = inlined_call_operand.vmem [shape: f32[2,256], index: 0, kind: input, shape index: {}]   ;;  %s989_s1 = inlined_call_operand.vmem [shape: f32[32,2], index: 1, kind: input, shape index: {}]   ;;  %s990_s2 = inlined_call_operand.vmem [shape: f32[32,1], index: 2, kind: input, shape index: {}]   ;;  %s991_s3 = inlined_call_operand.vmem [shape: f32[32,32], index: 3, kind: input, shape index: {}]   ;;  %s992_s4 = inlined_call_operand.vmem [shape: f32[32,1], index: 4, kind: input, shape index: {}]   ;;  %s993_s5 = inlined_call_operand.vmem [shape: f32[32,1], index: 5, kind: input, shape index: {}]   ;;  %s994_s6 = inlined_call_operand.<no memory space> [shape: f32[1,1], index: 6, kind: input, shape index: {}]   ;;  %s995_s7 = inlined_call_operand.hbm [shape: f32[1,256], index: 7, kind: output, shape index: {}]  }
   0x1   :  { %v12_v0 = vstv %s994_s6 }
   0x2   :  { %13 = vst [vmem:[#allocation2] sm:$0x1] %v12_v0 }
   0x3   :  { %14 = vsyncpa [#allocation4], 0 }
   0x4   :  { %16 = vsyncpa [#allocation4 + $0x1], 0  ;;  %s829_s26 = smov 0   ;;  %s831_s27 = smov 0  }
   0x5   :  { %s833_s28 = smov 0   ;;  %s835_s29 = smov 0  }
   0x6 LB: > { %s850_s6 = sadd.s32 4294967295, %s781_s29   ;;  %s615_s30 = sadd.s32 4294967294, %s781_s29   ;;  %s781_s29 = sphi %s835_s29, %s1001_s29   ;;  %s777_s28 = sphi %s833_s28, %s1000_s28   ;;  %s773_s27 = sphi %s831_s27, %s999_s27   ;;  %s769_s26 = sphi %s829_s26, %s998_s26  }
   0x7   : > { %s854_s8 = sadd.s32 1, %s781_s29   ;;  %s181_s9 = sadd.s32 1, %s777_s28 }
   0x8   : > { %s178_s10 = ssub.s32 %s781_s29, %s854_s8  ;;  %p191_p0 = scmp.ne.s32.totalorder %s777_s28, %s773_s27 }
   0x9   : > { %p179_p1 = scmp.eq.s32.totalorder %s178_s10, 0  ;;  %p192_p2 = scmp.eq.s32.totalorder %s850_s6, 1 }
   0xa   : > { %p197_p3 = scmp.ne.s32.totalorder %s773_s27, %s769_s26  ;;  %p198_p4 = scmp.eq.s32.totalorder %s615_s30, 1 }
   0xb   : > { %s865_s11 = scalar_select %p179_p1, %s777_s28, %s181_s9  }
   0xc   : > { %p867_p5 = por %p192_p2, %p191_p0  ;;  %p871_p6 = por %p198_p4, %p197_p3 }
   0xd   : > { %p618_p7 = scmp.ge.s32.totalorder %s781_s29, 1  ;;  %p241_p8 = scmp.lt.s32.totalorder %s781_s29, 3 }
   0xf   : > { %p242_p9 = pnand %p618_p7, %p241_p8 }
  0x10   : > { %p271_p10 = scmp.lt.s32.totalorder (!%p242_p9), %s850_s6, 1  ;;  %s269_s14 = sand.u32 (!%p242_p9), 1, %s773_s27  }
  0x11   : > { %245 = sbr.rel (%p242_p9) target bundleno = 440 (0x1b8), region = 48  ;;  %s624_s15 = sshll.u32 (!%p242_p9), %s850_s6, 4 }
  0x12   : > { %s270_s16 = scalar_lea.vmem (!%p242_p9), [#allocation3], %s269_s14 }
  0x13   : > { %s560_s17 = sshll.u32 (!%p242_p9), %s270_s16, 4  ;;  %s561_s17 = int_to_ptr.vmem [resolvable:$true] %s560_s17 }
  0x14   : > { %s721_s22 = scalar_lea.vmem (!%p242_p9), %s561_s17, 16 }
  0x15   : > { %p722_p11 = scmp.ne.s32.totalorder (!%p242_p9), %s561_s17, %s721_s22 }
  0x16   : > { %v279_v1 = vld [vmem:[%s989_s1 + $0x18] sm:$0xff]  ;;  %v278_v2 = vld [vmem:[%s989_s1 + $0x10] sm:$0xff]  ;;  %v783_v3 = vmov 1   ;;  %v784_v4 = vmov 0   ;;  %v277_v5 = vld [vmem:[%s989_s1 + $0x8] sm:$0xff]  ;;  %vm396_vm0 = vcmask 261120   ;;  %v304_v22 = vlaneseq }
  0x17   : > { %698 = vset.pattern.permute.xlu0 %v783_v3  ;;  %699 = vset.pattern.permute.xlu1 %v784_v4  ;;  %v276_v6 = vld [vmem:[%s989_s1] sm:$0xff]  ;;  %v283_v7 = vld [vmem:[%s990_s2 + $0x18] sm:$0xff]  ;;  %v281_v8 = vld [vmem:[%s990_s2 + $0x8] sm:$0xff]  ;;  %s272_s20 = scalar_select %p271_p10, %s850_s6, 1 }
  0x18   : > { %325 = vperm.xlu0 %698, %v279_v1   ;;  %296 = vperm.xlu1 %699, %v278_v2   ;;  %v372_v9 = vld [vmem:[%s992_s4] sm:$0xff]  ;;  %v282_v10 = vld [vmem:[%s990_s2 + $0x10] sm:$0xff]  ;;  %v373_v14 = vld [vmem:[%s992_s4 + $0x8] sm:$0xff]  ;;  %v935_v23 = vshrl.u32 %v304_v22, 7  ;;  %p723_p12 = pnand %p722_p11, %p867_p5  ;;  %s785_s6 = smov [#allocation3]  }
  0x19   : > { %v374_v11 = vld [vmem:[%s992_s4 + $0x10] sm:$0xff]  ;;  %v280_v12 = vld [vmem:[%s990_s2] sm:$0xff]  ;;  %v375_v16 = vld [vmem:[%s992_s4 + $0x18] sm:$0xff]  ;;  %s619_s21 = sshll.u32 %s272_s20, 1  ;;  %s558_s20 = scalar_lea.hbm %s995_s7, %s624_s15 }
  0x1a   : > { %v498_v13 = vld [vmem:[%s993_s5] sm:$0xff]  ;;  %v500_v15 = vld [vmem:[%s993_s5 + $0x10] sm:$0xff]  ;;  %v499_v18 = vld [vmem:[%s993_s5 + $0x8] sm:$0xff]  ;;  %s274_s24 = scalar_lea.vmem %s988_s0, %s619_s21  ;;  %v330_v26 = vsub.s32 1, %v935_v23  ;;  %v306_v27 = vsub.s32 0, %v935_v23  ;;  %s548_s21 = scalar_lea.sflag [#allocation4], %s269_s14 }
  0x1b   : > { %v502_v17 = vld [vmem:[#allocation2] sm:$0x1]  ;;  %v370_v20 = vld [vmem:[%s991_s3 + $0x10] sm:$0xff]  ;;  %v501_v21 = vld [vmem:[%s993_s5 + $0x18] sm:$0xff]  ;;  %p724_p13 = pneg %p723_p12  ;;  %s725_s23 = sshll.u32 %s785_s6, 4  ;;  %s726_s23 = int_to_ptr.vmem [resolvable:$false] %s725_s23 }
  0x1c   : > { %700 = vset.pattern.permute.xlu1 %v783_v3  ;;  %317 = vperm.xlu0 %698, %v277_v5   ;;  %v368_v19 = vld [vmem:[%s991_s3] sm:$0xff]  ;;  %v369_v61 = vld [vmem:[%s991_s3 + $0x8] sm:$0xff]  ;;  %v371_v62 = vld [vmem:[%s991_s3 + $0x18] sm:$0xff]  ;;  %p728_p0 = scmp.lt.s32.totalorder %s561_s17, %s726_s23 }
  0x1d   : > { %321 = vperm.xlu1 %700, %v278_v2   ;;  %643 = vmatprep.mubr.msk.f32.mxu0 %vm396_vm0, %v368_v19  ;;  %v275_v29 = vld [vmem:[%s274_s24] sm:$0x3]  ;;  %s727_s24 = scalar_lea.vmem %s726_s23, 32 }
  0x1e   : > { %646 = vmatprep.mubr.msk.f32.mxu1 %vm396_vm0, %v370_v20  ;;  %v331_v31 = vrot.slane %v275_v29, %v330_v26  ;;  %v307_v32 = vrot.slane %v275_v29, %v306_v27  ;;  %p729_p1 = scmp.lt.s32.totalorder %s727_s24, %s721_s22 }
  0x20   : > { %702 = vset.pattern.permute.xlu0 %v784_v4  ;;  %p730_p2 = por %p729_p1, %p728_p0 }
  0x21   : > { %701 = vset.pattern.permute.xlu1 %v784_v4  ;;  %301 = vperm.xlu0 %702, %v279_v1  }
  0x22   : > { %291 = vperm.xlu1 %701, %v277_v5   ;;  %p731_p3 = pnand %p730_p2, %p724_p13 }
  0x25   : > { %286 = vperm.xlu0 %702, %v276_v6  }
  0x26   : > { %357 = vperm.xlu1 %701, %v283_v7  }
  0x29   : > { %347 = vperm.xlu0 %702, %v281_v8  }
  0x2a   : > { %703 = vset.pattern.permute.xlu1 %v783_v3 }
  0x2b   : > { %313 = vperm.xlu1 %703, %v276_v6  }
  0x2d   : > { %378 = vperm.xlu0 %702, %v372_v9  }
  0x2f   : > { %704 = vset.pattern.permute.xlu1 %v784_v4 }
  0x30   : > { %352 = vperm.xlu1 %704, %v282_v10  }
  0x31   : > { %388 = vperm.xlu0 %702, %v374_v11  }
  0x34   : > { %342 = vperm.xlu1 %704, %v280_v12  }
  0x35   : > { %505 = vperm.xlu0 %702, %v498_v13  }
  0x38   : > { %383 = vperm.xlu1 %704, %v373_v14  }
  0x39   : > { %515 = vperm.xlu0 %702, %v500_v15  }
  0x3c   : > { %393 = vperm.xlu1 %704, %v375_v16  }
  0x3d   : > { %538 = vperm.xlu0 %702, %v502_v17  }
  0x40   : > { %510 = vperm.xlu1 %704, %v499_v18  }
  0x44   : > { %520 = vperm.xlu1 %704, %v501_v21  }
  0x93   : > { %v297_v24 = vpop.permute.xlu1 %296  ;;  %v326_v25 = vpop.permute.xlu0 %325 }
  0x94   : > { %v335_v33 = vmul.f32 %v331_v31, %v326_v25  ;;  %v310_v45 = vmul.f32 %v307_v32, %v297_v24 }
  0x97   : > { %v318_v28 = vpop.permute.xlu0 %317 }
  0x98   : > { %v322_v30 = vpop.permute.xlu1 %321  ;;  %v333_v42 = vmul.f32 %v331_v31, %v318_v28 }
  0x99   : > { %v334_v41 = vmul.f32 %v331_v31, %v322_v30 }
  0x9b   : > { %v338_v50 = vadd.f32 %v334_v41, %v310_v45 }
  0x9c   : > { %v302_v34 = vpop.permute.xlu0 %301 }
  0x9d   : > { %v311_v35 = vmul.f32 %v307_v32, %v302_v34  ;;  %v292_v36 = vpop.permute.xlu1 %291 }
  0x9e   : > { %v309_v43 = vmul.f32 %v307_v32, %v292_v36 }
  0x9f   : > { %v339_v37 = vadd.f32 %v335_v33, %v311_v35 }
  0xa0   : > { %v287_v40 = vpop.permute.xlu0 %286  ;;  %v337_v48 = vadd.f32 %v333_v42, %v309_v43 }
  0xa1   : > { %v358_v38 = vpop.permute.xlu1 %357  ;;  %v308_v47 = vmul.f32 %v307_v32, %v287_v40 }
  0xa2   : > { %v363_v39 = vadd.f32 %v358_v38, %v339_v37 }
  0xa4   : > { %705 = vtanh.f32 %v363_v39  ;;  %v348_v46 = vpop.permute.xlu0 %347 }
  0xa5   : > { %v361_v52 = vadd.f32 %v348_v46, %v337_v48 }
  0xa6   : > { %v314_v44 = vpop.permute.xlu1 %313 }
  0xa7   : > { %v332_v49 = vmul.f32 %v331_v31, %v314_v44 }
  0xa8   : > { %v379_v63 = vpop.permute.xlu0 %378 }
  0xa9   : > { %v336_v54 = vadd.f32 %v332_v49, %v308_v47 }
  0xab   : > { %v353_v51 = vpop.permute.xlu1 %352 }
  0xac   : > { %v362_v53 = vadd.f32 %v353_v51, %v338_v50  ;;  %v389_v3 = vpop.permute.xlu0 %388 }
  0xae   : > { %707 = vtanh.f32 %v362_v53 }
  0xaf   : > { %v343_v55 = vpop.permute.xlu1 %342  ;;  %709 = vtanh.f32 %v361_v52 }
  0xb0   : > { %v360_v56 = vadd.f32 %v343_v55, %v336_v54  ;;  %v506_v11 = vpop.permute.xlu0 %505 }
  0xb1   : > { %v706_v57 = vpop.eup %705 }
  0xb2   : > { %711 = vtanh.f32 %v360_v56  ;;  %635 = vmatprep.subr.mxu0 %v706_v57  ;;  %649 = vmatprep.subr.mxu1 %v706_v57 }
  0xb3   : > { %636 = vmatpush3.msra.mxu0 %v706_v57  ;;  %653 = vmatpush3.msra.mxu1 %v706_v57  ;;  %v384_v0 = vpop.permute.xlu1 %383 }
  0xb4   : > { %v516_v19 = vpop.permute.xlu0 %515 }
  0xb7   : > { %v394_v4 = vpop.permute.xlu1 %393 }
  0xb8   : > { %v539_v32 = vpop.permute.xlu0 %538 }
  0xb9   : > { %v544_v34 = vrot.slane %v539_v32, %v306_v27 }
  0xbb   : > { %v708_v58 = vpop.eup %707  ;;  %v511_v13 = vpop.permute.xlu1 %510 }
  0xbc   : > { %637 = vmatprep.subr.mxu0 %v708_v58  ;;  %650 = vmatprep.subr.mxu1 %v708_v58  ;;  %v710_v59 = vpop.eup %709 }
  0xbd   : > { %638 = vmatpush3.msra.mxu0 %v708_v58  ;;  %654 = vmatpush3.msra.mxu1 %v708_v58 }
  0xbe   : > { %639 = vmatprep.subr.mxu0 %v710_v59  ;;  %651 = vmatprep.subr.mxu1 %v710_v59 }
  0xbf   : > { %v712_v60 = vpop.eup %711  ;;  %640 = vmatpush3.msra.mxu0 %v710_v59  ;;  %655 = vmatpush3.msra.mxu1 %v710_v59  ;;  %v521_v22 = vpop.permute.xlu1 %520 }
  0xc0   : > { %641 = vmatprep.subr.mxu0 %v712_v60  ;;  %652 = vmatprep.subr.mxu1 %v712_v60 }
  0xc1   : > { %642 = vmatpush3.msra.mxu0 %v712_v60  ;;  %656 = vmatpush3.msra.mxu1 %v712_v60 }
  0xc2   : > { %644 = vmatmul.mubr.msk.f32.vlgmr.msra.gmra.mxu0 %vm396_vm0, %v369_v61  ;;  %647 = vmatmul.mubr.msk.f32.vlgmr.msra.gmra.mxu1 %vm396_vm0, %v371_v62 }
 0x182   : > { %v645_v1 = vpop.f32.mrf.mxu0  ;;  %v648_v2 = vpop.f32.mrf.mxu1 }
 0x183   : > { %v481_v5 = vadd.f32 %v645_v1, %v384_v0  ;;  %v491_v8 = vadd.f32 %v648_v2, %v394_v4 }
 0x184   : > { %v475_v6 = vpop.f32.mrf.mxu0  ;;  %v485_v7 = vpop.f32.mrf.mxu1 }
 0x185   : > { %713 = vtanh.f32 %v481_v5  ;;  %v476_v9 = vadd.f32 %v475_v6, %v379_v63  ;;  %v486_v10 = vadd.f32 %v485_v7, %v389_v3 }
 0x187   : > { %715 = vtanh.f32 %v476_v9 }
 0x188   : > { %717 = vtanh.f32 %v486_v10 }
 0x189   : > { %719 = vtanh.f32 %v491_v8 }
 0x192   : > { %v714_v12 = vpop.eup %713 }
 0x193   : > { %v524_v16 = vmul.f32 %v714_v12, %v511_v13 }
 0x194   : > { %v716_v14 = vpop.eup %715 }
 0x195   : > { %v718_v15 = vpop.eup %717  ;;  %v523_v17 = vmul.f32 %v716_v14, %v506_v11 }
 0x196   : > { %v720_v18 = vpop.eup %719  ;;  %v525_v21 = vmul.f32 %v718_v15, %v516_v19 }
 0x197   : > { %v527_v20 = vadd.f32 %v524_v16, %v523_v17  ;;  %v526_v24 = vmul.f32 %v720_v18, %v521_v22 }
 0x199   : > { %v528_v25 = vadd.f32 %v527_v20, %v525_v21 }
 0x19b   : > { %v529_v26 = vadd.f32 %v528_v25, %v526_v24 }
 0x19d   : > { %v530_v28 = vrot.slane %v529_v26, 4 }
 0x19f   : > { %v531_v29 = vadd.f32 %v530_v28, %v529_v26 }
 0x1a1   : > { %v532_v30 = vrot.slane %v531_v29, 2 }
 0x1a3   : > { %v533_v31 = vadd.f32 %v532_v30, %v531_v29 }
 0x1a5   : > { %v534_v33 = vrot.slane %v533_v31, 1 }
 0x1a7   : > { %v535_v35 = vadd.f32 %v534_v33, %v533_v31 }
 0x1a9   : > { %v545_v36 = vadd.f32 %v544_v34, %v535_v35 }
 0x1ab   : > { %546 = vst [vmem:[%s270_s16] sm:$0x1] %v545_v36 }
 0x1ac   : > { %734 = shalt.err (!%p731_p3)
}
 0x1ad   : > { %s735_s25 = scalar_lea.hbm %s558_s20, 16  ;;  %s739_s10 = scalar_lea.hbm %s995_s7, 32 }
 0x1ae   : > { %p736_p4 = scmp.ne.s32.totalorder %s558_s20, %s735_s25  ;;  %p740_p9 = scmp.lt.s32.totalorder %s558_s20, %s995_s7 }
 0x1af   : > { %p741_p10 = scmp.lt.s32.totalorder %s739_s10, %s735_s25 }
 0x1b0   : > { %p737_p7 = pnand %p736_p4, %p867_p5 }
 0x1b1   : > { %p742_p11 = por %p741_p10, %p740_p9 }
 0x1b2   : > { %p738_p8 = pneg %p737_p7 }
 0x1b4   : > { %p743_p12 = pnand %p742_p11, %p738_p8 }
 0x1b6   : > { %746 = shalt.err (!%p743_p12)
}
 0x1b7   : > { %657 = dma.vmem_to_hbm [thread:$0]  (%p867_p5), %s561_s17, 16, %s558_s20, %s548_s21  }
 0x1b8 PF: > { %p663_p13 = scmp.ge.s32.totalorder %s781_s29, 2  ;;  %s572_s16 = sand.u32 1, %s769_s26  }
 0x1b9   : > { %s573_s18 = scalar_lea.sflag [#allocation4], %s572_s16 }
 0x1ba   : > { %p660_p0 = pnand %p663_p13, %p871_p6 }
 0x1bc   : > { %p661_p1 = pneg %p660_p0 }
 0x1be   : > { %764 = dma.done.wait (%p661_p1), %s573_s18, 16  }
 0x1bf   : > { %766 = vsyncadd (%p661_p1), %s573_s18, 4294967280  ;;  %p19_p2 = scmp.ge.s32.totalorder %s854_s8, 4   ;;  %s998_s26 = smov %s773_s27 }
 0x1c0   : > { %s999_s27 = smov %s777_s28  ;;  %s1000_s28 = smov %s865_s11 }
 0x1c1   : > { %s1001_s29 = smov %s854_s8  ;;  %21 = sbr.rel (!%p19_p2) target bundleno = 6 (0x6), region = 83 }
 0x1c6   :  { %577 = vsyncpa [#allocation4], 1 }
 0x1c7   :  { %579 = vsyncpa [#allocation4 + $0x1], 1 }

</bundles_post_ra>
